<compile_context>
chip_gen: v6e
topology: v6e:2x2x1
jax: 0.10.0
libtpu: 0.0.40
codegen_flags: <defaults>
</compile_context>

<pallas_src>
import math

import jax
import jax.numpy as jnp
from jax.experimental import pallas as pl

# Model hyper-parameters (small, consistent with the module's __init__)
BATCH = 2
SEQ = 8
DIM = 32
N_HEADS = 4
HEAD_DIM = DIM // N_HEADS
HIDDEN = DIM * 4
EPS = 1e-6


def transformer_block_kernel(x_ref, cos_ref, sin_ref, attn_mask_ref, head_mask_ref,
                             aw_ref, fw_ref, wqkv_ref, wo_ref, w13_ref, w2_ref,
                             out_ref):
    D = DIM
    H = N_HEADS

    x = x_ref[...]                                          # (N, D) f32, N = B*S

    # ---- attention RMSNorm (f32 on VPU/XLU) ----
    var = jnp.mean(x * x, axis=-1, keepdims=True)
    xn = x * jax.lax.rsqrt(var + EPS) * aw_ref[...]

    # ---- fused QKV projection: [q*s, rot(q)*s, k, rot(k), v] in one MXU op (N, 5D) ----
    qkv = jnp.dot(xn.astype(jnp.bfloat16), wqkv_ref[...],
                  preferred_element_type=jnp.float32)

    cosf = cos_ref[...]                                     # (N, D) tiled RoPE tables
    sinf = sin_ref[...]
    q = qkv[:, 0 * D:1 * D] * cosf + qkv[:, 1 * D:2 * D] * sinf   # roped + pre-scaled q
    k = qkv[:, 2 * D:3 * D] * cosf + qkv[:, 3 * D:4 * D] * sinf   # roped k
    v = qkv[:, 4 * D:5 * D]

    # ---- block-diagonal stacked-head attention ----
    # head_mask[h*N + j, d] = 1 iff feature d belongs to head h  ->  k_bd / v_bd are
    # block-diagonal over heads; a single score matmul covers every head and batch element.
    head_mask = head_mask_ref[...]                          # (H*N, D) 0/1, f32
    k_bd = jnp.concatenate([k] * H, axis=0) * head_mask     # (H*N, D)
    v_bd = jnp.concatenate([v] * H, axis=0) * head_mask     # (H*N, D)

    scores = jax.lax.dot_general(                           # (N, H*N) = q . k_bd^T
        q.astype(jnp.bfloat16), k_bd.astype(jnp.bfloat16),
        (((1,), (1,)), ((), ())),
        preferred_element_type=jnp.float32)
    scores = scores + attn_mask_ref[...]                    # causal + cross-batch additive mask
    scores = scores - jnp.max(scores, axis=-1, keepdims=True)
    p = jnp.exp(scores)
    p_b = p.astype(jnp.bfloat16)

    # per-head row sums (broadcast over the head's feature block) and P@V in two MXU ops
    denom = jnp.dot(p_b, head_mask.astype(jnp.bfloat16),
                    preferred_element_type=jnp.float32)     # (N, D)
    ctx = jnp.dot(p_b, v_bd.astype(jnp.bfloat16),
                  preferred_element_type=jnp.float32)       # (N, D), already head-concatenated
    attn = ctx * pl.reciprocal(denom, approx=True)
    attn = jnp.dot(attn.astype(jnp.bfloat16), wo_ref[...],
                   preferred_element_type=jnp.float32)      # (N, D)

    h = x + attn

    # ---- ffn RMSNorm (f32) ----
    var2 = jnp.mean(h * h, axis=-1, keepdims=True)
    hn = h * jax.lax.rsqrt(var2 + EPS) * fw_ref[...]

    # ---- SwiGLU with fused W1/W3: one (N, 2*HIDDEN) matmul, aligned gate/up halves ----
    gu = jnp.dot(hn.astype(jnp.bfloat16), w13_ref[...],
                 preferred_element_type=jnp.float32)
    g = gu[:, :HIDDEN]
    u = gu[:, HIDDEN:]
    ff = jnp.dot((jax.nn.silu(g) * u).astype(jnp.bfloat16), w2_ref[...],
                 preferred_element_type=jnp.float32)        # (N, D)

    out_ref[...] = h + ff


@jax.jit
def transformer_block(x, cos, sin, mask, aw, wq, wk, wv, wo, fw, w1, w2, w3):
    B, S, D = x.shape
    H, hd = N_HEADS, HEAD_DIM
    N = B * S
    f32, bf16 = jnp.float32, jnp.bfloat16

    # ---- fold rotate_half (per-head signed permutation) + 1/sqrt(hd) into one QKV weight ----
    half = hd // 2
    r_head = jnp.block([[jnp.zeros((half, half), f32), jnp.eye(half, dtype=f32)],
                        [-jnp.eye(half, dtype=f32), jnp.zeros((half, half), f32)]])
    rot = jnp.kron(jnp.eye(H, dtype=f32), r_head)           # (D, D): x @ rot == per-head rotate_half(x)
    scale = 1.0 / math.sqrt(hd)
    wqkv = jnp.concatenate(
        [wq * scale, (wq @ rot) * scale, wk, wk @ rot, wv], axis=1).astype(bf16)   # (D, 5D)
    w13 = jnp.concatenate([w1, w3], axis=1).astype(bf16)    # (D, 2*HIDDEN)

    # ---- RoPE tables tiled over batch (rows) and heads (lanes): (N, D) ----
    cos_full = jnp.tile(cos, (B, H)).astype(f32)
    sin_full = jnp.tile(sin, (B, H)).astype(f32)

    # ---- additive mask for the (N, H*N) block-diagonal score layout:
    #      user mask within the same batch element, -1e9 across batch elements ----
    rb = jnp.repeat(jnp.arange(B), S)
    same_batch = rb[:, None] == rb[None, :]
    mask_bs = jnp.where(same_batch, jnp.tile(mask, (B, B)), jnp.float32(-1e9))     # (N, N)
    attn_mask = jnp.tile(mask_bs, (1, H)).astype(f32)                              # (N, H*N)

    # ---- 0/1 head-selection mask: head_mask[h*N + j, d] = 1 iff d in head h ----
    hrow = jnp.repeat(jnp.arange(H), N)
    hcol = jnp.repeat(jnp.arange(H), hd)
    head_mask = (hrow[:, None] == hcol[None, :]).astype(f32)                       # (H*N, D)

    out2d = pl.pallas_call(
        transformer_block_kernel,
        out_shape=jax.ShapeDtypeStruct((N, D), f32),
    )(x.reshape(N, D), cos_full, sin_full, attn_mask, head_mask,
      aw, fw, wqkv, wo.astype(bf16), w13, w2.astype(bf16))
    return out2d.reshape(B, S, D)


# ------------------- pure-JAX f32 reference (mirrors the PyTorch module) -------------------
def _ref_block(x, cos, sin, mask, aw, wq, wk, wv, wo, fw, w1, w2, w3):
    def rms(t, w):
        var = jnp.mean(t * t, axis=-1, keepdims=True)
        return t * jax.lax.rsqrt(var + EPS) * w

    def rot(t):
        half = t.shape[-1] // 2
        return jnp.concatenate([-t[..., half:], t[..., :half]], axis=-1)

    B, S, D = x.shape
    xn = rms(x, aw)
    q = (xn @ wq).reshape(B, S, N_HEADS, HEAD_DIM)
    k = (xn @ wk).reshape(B, S, N_HEADS, HEAD_DIM)
    v = (xn @ wv).reshape(B, S, N_HEADS, HEAD_DIM)
    c = cos[None, :, None, :]
    s_ = sin[None, :, None, :]
    q = q * c + rot(q) * s_
    k = k * c + rot(k) * s_
    q, k, v = (t.transpose(0, 2, 1, 3) for t in (q, k, v))          # (B, H, S, hd)
    scores = jnp.einsum('bhqd,bhkd->bhqk', q, k) / math.sqrt(HEAD_DIM) + mask
    p = jax.nn.softmax(scores, axis=-1)
    o = jnp.einsum('bhqk,bhkd->bhqd', p, v).transpose(0, 2, 1, 3).reshape(B, S, D)
    h = x + o @ wo
    hn = rms(h, fw)
    ff = (jax.nn.silu(hn @ w1) * (hn @ w3)) @ w2
    return h + ff


if __name__ == "__main__":
    key = jax.random.PRNGKey(0)
    keys = jax.random.split(key, 12)

    x = jax.random.normal(keys[0], (BATCH, SEQ, DIM), jnp.float32)

    # RoPE tables (S, head_dim)
    pos = jnp.arange(SEQ, dtype=jnp.float32)[:, None]
    inv_freq = 1.0 / (10000.0 ** (jnp.arange(0, HEAD_DIM, 2, dtype=jnp.float32) / HEAD_DIM))
    freqs = pos * inv_freq[None, :]
    emb = jnp.concatenate([freqs, freqs], axis=-1)
    cos = jnp.cos(emb).astype(jnp.float32)
    sin = jnp.sin(emb).astype(jnp.float32)

    # causal additive mask (S, S)
    causal = jnp.tril(jnp.ones((SEQ, SEQ), jnp.bool_))
    mask = jnp.where(causal, 0.0, -1e9).astype(jnp.float32)

    scale = 0.05
    wq = scale * jax.random.normal(keys[1], (DIM, DIM), jnp.float32)
    wk = scale * jax.random.normal(keys[2], (DIM, DIM), jnp.float32)
    wv = scale * jax.random.normal(keys[3], (DIM, DIM), jnp.float32)
    wo = scale * jax.random.normal(keys[4], (DIM, DIM), jnp.float32)
    w1 = scale * jax.random.normal(keys[5], (DIM, HIDDEN), jnp.float32)
    w2 = scale * jax.random.normal(keys[6], (HIDDEN, DIM), jnp.float32)
    w3 = scale * jax.random.normal(keys[7], (DIM, HIDDEN), jnp.float32)
    # RMSNorm weights (ones in PyTorch init; perturb to exercise the scale), kept 2-D for TPU layout
    aw = 1.0 + 0.1 * jax.random.normal(keys[8], (1, DIM), jnp.float32)
    fw = 1.0 + 0.1 * jax.random.normal(keys[9], (1, DIM), jnp.float32)

    out = transformer_block(x, cos, sin, mask, aw, wq, wk, wv, wo, fw, w1, w2, w3)
    out = jax.block_until_ready(out)

    ref = _ref_block(x, cos, sin, mask, aw, wq, wk, wv, wo, fw, w1, w2, w3)
    assert out.shape == (BATCH, SEQ, DIM)
    # bf16 MXU operands + approx reciprocal -> loosen tolerance vs the f32 reference
    assert jnp.allclose(out, ref, atol=2e-2, rtol=2e-2), "mismatch vs pure-JAX reference"

    print("KERNEL_OK")
</pallas_src>

<mosaic_0001>
module attributes {stable_mosaic.version = 11 : i64} {
  func.func @transformer_block_kernel(%arg0: memref<16x32xf32, #tpu.memory_space<vmem>>, %arg1: memref<16x32xf32, #tpu.memory_space<vmem>>, %arg2: memref<16x32xf32, #tpu.memory_space<vmem>>, %arg3: memref<16x64xf32, #tpu.memory_space<vmem>>, %arg4: memref<64x32xf32, #tpu.memory_space<vmem>>, %arg5: memref<1x32xf32, #tpu.memory_space<vmem>>, %arg6: memref<1x32xf32, #tpu.memory_space<vmem>>, %arg7: memref<32x160xbf16, #tpu.memory_space<vmem>>, %arg8: memref<32x32xbf16, #tpu.memory_space<vmem>>, %arg9: memref<32x256xbf16, #tpu.memory_space<vmem>>, %arg10: memref<128x32xbf16, #tpu.memory_space<vmem>>, %arg11: memref<16x32xf32, #tpu.memory_space<vmem>>) attributes {dimension_semantics = [], scalar_prefetch = 0 : i64, scratch_operands = 0 : i64, tpu.core_type = #tpu.core_type<tc>} {
    %c0 = arith.constant 0 : index
    %c0_0 = arith.constant 0 : index
    %0 = vector.load %arg0[%c0, %c0_0] : memref<16x32xf32, #tpu.memory_space<vmem>>, vector<16x32xf32>
    %1 = arith.mulf %0, %0 : vector<16x32xf32>
    %cst = arith.constant dense<0.000000e+00> : vector<16xf32>
    %2 = vector.multi_reduction <add>, %1, %cst [1] : vector<16x32xf32> to vector<16xf32>
    %3 = vector.shape_cast %2 : vector<16xf32> to vector<16x1xf32>
    %cst_1 = arith.constant 3.200000e+01 : f32
    %4 = vector.broadcast %cst_1 : f32 to vector<16x1xf32>
    %5 = arith.divf %3, %4 : vector<16x1xf32>
    %cst_2 = arith.constant 9.99999997E-7 : f32
    %6 = vector.broadcast %cst_2 : f32 to vector<16x1xf32>
    %7 = arith.addf %5, %6 : vector<16x1xf32>
    %8 = math.rsqrt %7 : vector<16x1xf32>
    %9 = vector.broadcast %8 : vector<16x1xf32> to vector<16x32xf32>
    %10 = arith.mulf %0, %9 : vector<16x32xf32>
    %c0_3 = arith.constant 0 : index
    %c0_4 = arith.constant 0 : index
    %11 = vector.load %arg5[%c0_3, %c0_4] : memref<1x32xf32, #tpu.memory_space<vmem>>, vector<1x32xf32>
    %12 = vector.broadcast %11 : vector<1x32xf32> to vector<16x32xf32>
    %13 = arith.mulf %10, %12 : vector<16x32xf32>
    %14 = arith.truncf %13 : vector<16x32xf32> to vector<16x32xbf16>
    %c0_5 = arith.constant 0 : index
    %c0_6 = arith.constant 0 : index
    %15 = vector.load %arg7[%c0_5, %c0_6] : memref<32x160xbf16, #tpu.memory_space<vmem>>, vector<32x160xbf16>
    %cst_7 = arith.constant dense<0.000000e+00> : vector<16x160xf32>
    %16 = tpu.matmul %14, %15, %cst_7 {dimension_numbers = #tpu.dot_dimension_numbers<[1], [0], [0], [1], [0, 0, 1, 1], [], []>} : vector<16x32xbf16>, vector<32x160xbf16>, vector<16x160xf32> -> vector<16x160xf32>
    %c0_8 = arith.constant 0 : index
    %c0_9 = arith.constant 0 : index
    %17 = vector.load %arg1[%c0_8, %c0_9] : memref<16x32xf32, #tpu.memory_space<vmem>>, vector<16x32xf32>
    %c0_10 = arith.constant 0 : index
    %c0_11 = arith.constant 0 : index
    %18 = vector.load %arg2[%c0_10, %c0_11] : memref<16x32xf32, #tpu.memory_space<vmem>>, vector<16x32xf32>
    %19 = vector.extract_strided_slice %16 {offsets = [0, 0], sizes = [16, 32], strides = [1, 1]} : vector<16x160xf32> to vector<16x32xf32>
    %20 = arith.mulf %19, %17 : vector<16x32xf32>
    %21 = vector.extract_strided_slice %16 {offsets = [0, 32], sizes = [16, 32], strides = [1, 1]} : vector<16x160xf32> to vector<16x32xf32>
    %22 = arith.mulf %21, %18 : vector<16x32xf32>
    %23 = arith.addf %20, %22 : vector<16x32xf32>
    %24 = vector.extract_strided_slice %16 {offsets = [0, 64], sizes = [16, 32], strides = [1, 1]} : vector<16x160xf32> to vector<16x32xf32>
    %25 = arith.mulf %24, %17 : vector<16x32xf32>
    %26 = vector.extract_strided_slice %16 {offsets = [0, 96], sizes = [16, 32], strides = [1, 1]} : vector<16x160xf32> to vector<16x32xf32>
    %27 = arith.mulf %26, %18 : vector<16x32xf32>
    %28 = arith.addf %25, %27 : vector<16x32xf32>
    %29 = vector.extract_strided_slice %16 {offsets = [0, 128], sizes = [16, 32], strides = [1, 1]} : vector<16x160xf32> to vector<16x32xf32>
    %c0_12 = arith.constant 0 : index
    %c0_13 = arith.constant 0 : index
    %30 = vector.load %arg4[%c0_12, %c0_13] : memref<64x32xf32, #tpu.memory_space<vmem>>, vector<64x32xf32>
    %31 = tpu.concatenate %28, %28, %28, %28 in 0 : vector<16x32xf32>, vector<16x32xf32>, vector<16x32xf32>, vector<16x32xf32> -> vector<64x32xf32>
    %32 = arith.mulf %31, %30 : vector<64x32xf32>
    %33 = tpu.concatenate %29, %29, %29, %29 in 0 : vector<16x32xf32>, vector<16x32xf32>, vector<16x32xf32>, vector<16x32xf32> -> vector<64x32xf32>
    %34 = arith.mulf %33, %30 : vector<64x32xf32>
    %35 = arith.truncf %23 : vector<16x32xf32> to vector<16x32xbf16>
    %36 = arith.truncf %32 : vector<64x32xf32> to vector<64x32xbf16>
    %cst_14 = arith.constant dense<0.000000e+00> : vector<16x64xf32>
    %37 = tpu.matmul %35, %36, %cst_14 {dimension_numbers = #tpu.dot_dimension_numbers<[1], [1], [0], [0], [0, 0, 1, 0], [], []>} : vector<16x32xbf16>, vector<64x32xbf16>, vector<16x64xf32> -> vector<16x64xf32>
    %c0_15 = arith.constant 0 : index
    %c0_16 = arith.constant 0 : index
    %38 = vector.load %arg3[%c0_15, %c0_16] : memref<16x64xf32, #tpu.memory_space<vmem>>, vector<16x64xf32>
    %39 = arith.addf %37, %38 : vector<16x64xf32>
    %cst_17 = arith.constant dense<0xFF800000> : vector<16xf32>
    %40 = vector.multi_reduction <maximumf>, %39, %cst_17 [1] : vector<16x64xf32> to vector<16xf32>
    %41 = vector.shape_cast %40 : vector<16xf32> to vector<16x1xf32>
    %42 = vector.broadcast %41 : vector<16x1xf32> to vector<16x64xf32>
    %43 = arith.subf %39, %42 : vector<16x64xf32>
    %44 = math.exp %43 : vector<16x64xf32>
    %45 = arith.truncf %44 : vector<16x64xf32> to vector<16x64xbf16>
    %46 = arith.truncf %30 : vector<64x32xf32> to vector<64x32xbf16>
    %cst_18 = arith.constant dense<0.000000e+00> : vector<16x32xf32>
    %47 = tpu.matmul %45, %46, %cst_18 {dimension_numbers = #tpu.dot_dimension_numbers<[1], [0], [0], [1], [0, 0, 1, 1], [], []>} : vector<16x64xbf16>, vector<64x32xbf16>, vector<16x32xf32> -> vector<16x32xf32>
    %48 = arith.truncf %34 : vector<64x32xf32> to vector<64x32xbf16>
    %cst_19 = arith.constant dense<0.000000e+00> : vector<16x32xf32>
    %49 = tpu.matmul %45, %48, %cst_19 {dimension_numbers = #tpu.dot_dimension_numbers<[1], [0], [0], [1], [0, 0, 1, 1], [], []>} : vector<16x64xbf16>, vector<64x32xbf16>, vector<16x32xf32> -> vector<16x32xf32>
    %50 = tpu.reciprocal %47 {approx = true} : vector<16x32xf32> -> vector<16x32xf32>
    %51 = arith.mulf %49, %50 : vector<16x32xf32>
    %52 = arith.truncf %51 : vector<16x32xf32> to vector<16x32xbf16>
    %c0_20 = arith.constant 0 : index
    %c0_21 = arith.constant 0 : index
    %53 = vector.load %arg8[%c0_20, %c0_21] : memref<32x32xbf16, #tpu.memory_space<vmem>>, vector<32x32xbf16>
    %cst_22 = arith.constant dense<0.000000e+00> : vector<16x32xf32>
    %54 = tpu.matmul %52, %53, %cst_22 {dimension_numbers = #tpu.dot_dimension_numbers<[1], [0], [0], [1], [0, 0, 1, 1], [], []>} : vector<16x32xbf16>, vector<32x32xbf16>, vector<16x32xf32> -> vector<16x32xf32>
    %55 = arith.addf %0, %54 : vector<16x32xf32>
    %56 = arith.mulf %55, %55 : vector<16x32xf32>
    %cst_23 = arith.constant dense<0.000000e+00> : vector<16xf32>
    %57 = vector.multi_reduction <add>, %56, %cst_23 [1] : vector<16x32xf32> to vector<16xf32>
    %58 = vector.shape_cast %57 : vector<16xf32> to vector<16x1xf32>
    %cst_24 = arith.constant 3.200000e+01 : f32
    %59 = vector.broadcast %cst_24 : f32 to vector<16x1xf32>
    %60 = arith.divf %58, %59 : vector<16x1xf32>
    %cst_25 = arith.constant 9.99999997E-7 : f32
    %61 = vector.broadcast %cst_25 : f32 to vector<16x1xf32>
    %62 = arith.addf %60, %61 : vector<16x1xf32>
    %63 = math.rsqrt %62 : vector<16x1xf32>
    %64 = vector.broadcast %63 : vector<16x1xf32> to vector<16x32xf32>
    %65 = arith.mulf %55, %64 : vector<16x32xf32>
    %c0_26 = arith.constant 0 : index
    %c0_27 = arith.constant 0 : index
    %66 = vector.load %arg6[%c0_26, %c0_27] : memref<1x32xf32, #tpu.memory_space<vmem>>, vector<1x32xf32>
    %67 = vector.broadcast %66 : vector<1x32xf32> to vector<16x32xf32>
    %68 = arith.mulf %65, %67 : vector<16x32xf32>
    %69 = arith.truncf %68 : vector<16x32xf32> to vector<16x32xbf16>
    %c0_28 = arith.constant 0 : index
    %c0_29 = arith.constant 0 : index
    %70 = vector.load %arg9[%c0_28, %c0_29] : memref<32x256xbf16, #tpu.memory_space<vmem>>, vector<32x256xbf16>
    %cst_30 = arith.constant dense<0.000000e+00> : vector<16x256xf32>
    %71 = tpu.matmul %69, %70, %cst_30 {dimension_numbers = #tpu.dot_dimension_numbers<[1], [0], [0], [1], [0, 0, 1, 1], [], []>} : vector<16x32xbf16>, vector<32x256xbf16>, vector<16x256xf32> -> vector<16x256xf32>
    %72 = vector.extract_strided_slice %71 {offsets = [0, 0], sizes = [16, 128], strides = [1, 1]} : vector<16x256xf32> to vector<16x128xf32>
    %73 = vector.extract_strided_slice %71 {offsets = [0, 128], sizes = [16, 128], strides = [1, 1]} : vector<16x256xf32> to vector<16x128xf32>
    %74 = arith.negf %72 : vector<16x128xf32>
    %75 = math.exp %74 : vector<16x128xf32>
    %cst_31 = arith.constant 1.000000e+00 : f32
    %76 = vector.broadcast %cst_31 : f32 to vector<16x128xf32>
    %77 = arith.addf %76, %75 : vector<16x128xf32>
    %78 = arith.divf %76, %77 : vector<16x128xf32>
    %79 = arith.mulf %72, %78 : vector<16x128xf32>
    %80 = arith.mulf %79, %73 : vector<16x128xf32>
    %81 = arith.truncf %80 : vector<16x128xf32> to vector<16x128xbf16>
    %c0_32 = arith.constant 0 : index
    %c0_33 = arith.constant 0 : index
    %82 = vector.load %arg10[%c0_32, %c0_33] : memref<128x32xbf16, #tpu.memory_space<vmem>>, vector<128x32xbf16>
    %cst_34 = arith.constant dense<0.000000e+00> : vector<16x32xf32>
    %83 = tpu.matmul %81, %82, %cst_34 {dimension_numbers = #tpu.dot_dimension_numbers<[1], [0], [0], [1], [0, 0, 1, 1], [], []>} : vector<16x128xbf16>, vector<128x32xbf16>, vector<16x32xf32> -> vector<16x32xf32>
    %84 = arith.addf %55, %83 : vector<16x32xf32>
    %c0_35 = arith.constant 0 : index
    %c0_36 = arith.constant 0 : index
    %85 = vector.load %arg11[%c0_35, %c0_36] : memref<16x32xf32, #tpu.memory_space<vmem>>, vector<16x32xf32>
    tpu.vector_store %arg11[%c0_35, %c0_36], %84 {strides = array<i32>} : memref<16x32xf32, #tpu.memory_space<vmem>>, vector<16x32xf32>,
    return
  }
}

</mosaic_0001>

<bundles_post_ra>
// kernel: tile.33
= control target key start
LH: loop header
LB: loop body
LE: loop exit
PB: predicated region body
PF: predicated region fallthrough
CT: control target
= control target key end

     0   :  { %s154_s0 = inlined_call_operand.vmem [shape: f32[8,8], index: 0, kind: input, shape index: {}]   ;;  %s155_s1 = inlined_call_operand.vmem [shape: f32[2,8,2,8], index: 1, kind: output, shape index: {}]  }
   0x1   :  { %v4_v0 = vld [vmem:[%s154_s0] ss:$0 sm:$0xff]  ;;  %v51_v1 = vld [vmem:[%s154_s0 + $0x1] ss:$0 sm:$0xff]  ;;  %v54_v2 = vld [vmem:[%s154_s0 + $0x2] ss:$0 sm:$0xff] }
   0x2   :  { %5 = vst [vmem:[%s155_s1] sm:$0x3] %v4_v0  ;;  %50 = vst [vmem:[%s155_s1 + $0x10] sm:$0x3] %v4_v0  ;;  %v57_v3 = vld [vmem:[%s154_s0 + $0x3] ss:$0 sm:$0xff] }
   0x3   :  { %52 = vst [vmem:[%s155_s1 + $0x2] sm:$0x3] %v51_v1  ;;  %53 = vst [vmem:[%s155_s1 + $0x12] sm:$0x3] %v51_v1  ;;  %v60_v4 = vld [vmem:[%s154_s0 + $0x4] ss:$0 sm:$0xff] }
   0x4   :  { %55 = vst [vmem:[%s155_s1 + $0x4] sm:$0x3] %v54_v2  ;;  %56 = vst [vmem:[%s155_s1 + $0x14] sm:$0x3] %v54_v2  ;;  %v63_v5 = vld [vmem:[%s154_s0 + $0x5] ss:$0 sm:$0xff] }
   0x5   :  { %58 = vst [vmem:[%s155_s1 + $0x6] sm:$0x3] %v57_v3  ;;  %59 = vst [vmem:[%s155_s1 + $0x16] sm:$0x3] %v57_v3  ;;  %v66_v6 = vld [vmem:[%s154_s0 + $0x6] ss:$0 sm:$0xff] }
   0x6   :  { %61 = vst [vmem:[%s155_s1 + $0x8] sm:$0x3] %v60_v4  ;;  %62 = vst [vmem:[%s155_s1 + $0x18] sm:$0x3] %v60_v4  ;;  %v69_v7 = vld [vmem:[%s154_s0 + $0x7] ss:$0 sm:$0xff] }
   0x7   :  { %64 = vst [vmem:[%s155_s1 + $0xa] sm:$0x3] %v63_v5  ;;  %65 = vst [vmem:[%s155_s1 + $0x1a] sm:$0x3] %v63_v5 }
   0x8   :  { %67 = vst [vmem:[%s155_s1 + $0xc] sm:$0x3] %v66_v6  ;;  %68 = vst [vmem:[%s155_s1 + $0x1c] sm:$0x3] %v66_v6 }
   0x9   :  { %70 = vst [vmem:[%s155_s1 + $0xe] sm:$0x3] %v69_v7  ;;  %71 = vst [vmem:[%s155_s1 + $0x1e] sm:$0x3] %v69_v7 }

// kernel: tile.39
= control target key start
LH: loop header
LB: loop body
LE: loop exit
PB: predicated region body
PF: predicated region fallthrough
CT: control target
= control target key end

     0   :  { %vm83_vm0 = vcmask 1047556   ;;  %vm85_vm1 = vcmask 130048   ;;  %s196_s9 = smov 48   ;;  %s197_s14 = smov 16   ;;  %vm104_vm2 = vcmask 523648   ;;  %vm125_vm3 = vcmask 392448   ;;  %s290_s0 = inlined_call_operand.vmem [shape: f32[16,4,16], index: 0, kind: input, shape index: {}]   ;;  %s291_s1 = inlined_call_operand.vmem [shape: f32[16,64], index: 1, kind: output, shape index: {}]  }
   0x1   :  { %v181_v0 = vld [vmem:[%s290_s0 + $0x1c] sm:$0xf]  ;;  %v182_v1 = vld [vmem:[%s290_s0 + $0x18] sm:$0xf]  ;;  %v183_v2 = vld [vmem:[%s290_s0 + $0x14] sm:$0xf] }
   0x2   :  { %49 = vst [vmem:[#allocation0 + $0x38] sm:$0xf] %v181_v0  ;;  %54 = vst [vmem:[#allocation0 + $0x30] sm:$0xf] %v182_v1  ;;  %v184_v3 = vld [vmem:[%s290_s0 + $0x10] sm:$0xf] }
   0x3   :  { %59 = vst [vmem:[#allocation0 + $0x28] sm:$0xf] %v183_v2  ;;  %v185_v4 = vld [vmem:[%s290_s0 + $0xc] sm:$0xf]  ;;  %v186_v5 = vld [vmem:[%s290_s0 + $0x8] sm:$0xf] }
   0x4   :  { %64 = vst [vmem:[#allocation0 + $0x20] sm:$0xf] %v184_v3  ;;  %69 = vst [vmem:[#allocation0 + $0x18] sm:$0xf] %v185_v4  ;;  %v187_v6 = vld [vmem:[%s290_s0 + $0x4] sm:$0xf] }
   0x5   :  { %74 = vst [vmem:[#allocation0 + $0x10] sm:$0xf] %v186_v5  ;;  %v79_v7 = vld [vmem:[%s290_s0] sm:$0xf]  ;;  %78 = vst [vmem:[#allocation0 + $0x8] sm:$0xf] %v187_v6 }
   0x6   :  { %80 = vst [vmem:[#allocation0] sm:$0xf] %v79_v7  ;;  %v173_v8 = vld [vmem:[%s290_s0 + $0x3c] sm:$0xf]  ;;  %v174_v9 = vld [vmem:[%s290_s0 + $0x38] sm:$0xf] }
   0x7   :  { %9 = vst [vmem:[#allocation0 + $0x78] sm:$0xf] %v173_v8  ;;  %14 = vst [vmem:[#allocation0 + $0x70] sm:$0xf] %v174_v9  ;;  %v175_v10 = vld [vmem:[%s290_s0 + $0x34] sm:$0xf] }
   0x8   :  { %v176_v11 = vld [vmem:[%s290_s0 + $0x30] sm:$0xf]  ;;  %v177_v12 = vld [vmem:[%s290_s0 + $0x2c] sm:$0xf]  ;;  %19 = vst [vmem:[#allocation0 + $0x68] sm:$0xf] %v175_v10 }
   0x9   :  { %24 = vst [vmem:[#allocation0 + $0x60] sm:$0xf] %v176_v11  ;;  %29 = vst [vmem:[#allocation0 + $0x58] sm:$0xf] %v177_v12  ;;  %v178_v13 = vld [vmem:[%s290_s0 + $0x28] sm:$0xf] }
   0xa   :  { %v179_v14 = vld [vmem:[%s290_s0 + $0x24] sm:$0xf]  ;;  %v180_v15 = vld [vmem:[%s290_s0 + $0x20] sm:$0xf]  ;;  %34 = vst [vmem:[#allocation0 + $0x50] sm:$0xf] %v178_v13 }
   0xb   :  { %39 = vst [vmem:[#allocation0 + $0x48] sm:$0xf] %v179_v14  ;;  %44 = vst [vmem:[#allocation0 + $0x40] sm:$0xf] %v180_v15  ;;  %s195_s0 = smov 32   ;;  %vm146_vm4 = vcmask 261248  }
   0xc   :  { %v120_v16 = vld [vmem:[#allocation0 + $0x2] ss:$8 sm:$0xf0]   ;;  %v99_v17 = vld [vmem:[#allocation0 + $0x3] ss:$8 sm:$0xf0]  }
   0xd   :  { %v118_v18 = vld [vmem:[#allocation0 + $0x2] ss:$8 sm:$0xf]   ;;  %v97_v19 = vld [vmem:[#allocation0 + $0x3] ss:$8 sm:$0xf]  }
   0xe   :  { %v122_v20 = vsel %vm83_vm0, %v120_v16, %v118_v18  ;;  %v101_v21 = vsel %vm83_vm0, %v99_v17, %v97_v19  ;;  %v139_v24 = vld [vmem:[#allocation0 + $0x1] ss:$8 sm:$0xf]   ;;  %v81_v32 = vld [vmem:[#allocation0] ss:$8 sm:$0xf]  }
   0xf   :  { %123 = vrot.lane.b32.xlu1 %v122_v20, %s195_s0  ;;  %102 = vrot.lane.b32.xlu0 %v101_v21, %s196_s9  ;;  %v141_v25 = vld [vmem:[#allocation0 + $0x1] ss:$8 sm:$0xf0]   ;;  %v82_v33 = vld [vmem:[#allocation0] ss:$8 sm:$0xf0]  }
  0x10   :  { %v130_v22 = vld [vmem:[#allocation0 + $0x42] ss:$8 sm:$0xf0]   ;;  %v109_v23 = vld [vmem:[#allocation0 + $0x43] ss:$8 sm:$0xf0]   ;;  %v84_v34 = vsel %vm83_vm0, %v82_v33, %v81_v32  ;;  %v143_v38 = vsel %vm83_vm0, %v141_v25, %v139_v24 }
  0x11   :  { %v151_v31 = vld [vmem:[#allocation0 + $0x41] ss:$8 sm:$0xf0]   ;;  %v90_v36 = vld [vmem:[#allocation0 + $0x40] ss:$8 sm:$0xf0]  }
  0x12   :  { %v128_v26 = vld [vmem:[#allocation0 + $0x42] ss:$8 sm:$0xf]   ;;  %v107_v27 = vld [vmem:[#allocation0 + $0x43] ss:$8 sm:$0xf]  }
  0x13   :  { %v132_v28 = vsel %vm83_vm0, %v130_v22, %v128_v26  ;;  %v111_v29 = vsel %vm83_vm0, %v109_v23, %v107_v27  ;;  %v149_v30 = vld [vmem:[#allocation0 + $0x41] ss:$8 sm:$0xf]   ;;  %v88_v35 = vld [vmem:[#allocation0 + $0x40] ss:$8 sm:$0xf]  }
  0x14   :  { %133 = vrot.lane.b32.xlu1 %v132_v28, %s195_s0  ;;  %112 = vrot.lane.b32.xlu0 %v111_v29, %s196_s9  ;;  %v153_v37 = vsel %vm83_vm0, %v151_v31, %v149_v30  ;;  %86 = vst.msk [vmem:[%s291_s1] sm:$0xff] %vm85_vm1, %v84_v34   ;;  %v92_v39 = vsel %vm83_vm0, %v90_v36, %v88_v35 }
  0x15   :  { %188 = vst.msk [vmem:[%s291_s1 + $0x8] sm:$0xff] %vm85_vm1, %v92_v39  }
  0x18   :  { %154 = vrot.lane.b32.xlu1 %v153_v37, %s197_s14  ;;  %144 = vrot.lane.b32.xlu0 %v143_v38, %s197_s14 }
  0x81   :  { %v124_v40 = vpop.permute.xlu1 %123   ;;  %v103_v41 = vpop.permute.xlu0 %102  }
  0x82   :  { %105 = vst.msk [vmem:[%s291_s1] sm:$0xff] %vm104_vm2, %v103_v41  }
  0x83   :  { %126 = vst.msk [vmem:[%s291_s1] sm:$0xff] %vm125_vm3, %v124_v40  }
  0x86   :  { %v134_v42 = vpop.permute.xlu1 %133   ;;  %v113_v43 = vpop.permute.xlu0 %112  }
  0x87   :  { %189 = vst.msk [vmem:[%s291_s1 + $0x8] sm:$0xff] %vm104_vm2, %v113_v43  }
  0x88   :  { %190 = vst.msk [vmem:[%s291_s1 + $0x8] sm:$0xff] %vm125_vm3, %v134_v42  }
  0x8a   :  { %v155_v44 = vpop.permute.xlu1 %154   ;;  %v145_v45 = vpop.permute.xlu0 %144  }
  0x8b   :  { %191 = vst.msk [vmem:[%s291_s1 + $0x8] sm:$0xff] %vm146_vm4, %v155_v44   ;;  %147 = vst.msk [vmem:[%s291_s1] sm:$0xff] %vm146_vm4, %v145_v45  }

// kernel: tile.23
= control target key start
LH: loop header
LB: loop body
LE: loop exit
PB: predicated region body
PF: predicated region fallthrough
CT: control target
= control target key end

     0   :  { %s154_s0 = inlined_call_operand.vmem [shape: f32[8,8], index: 0, kind: input, shape index: {}]   ;;  %s155_s1 = inlined_call_operand.vmem [shape: f32[2,8,4,8], index: 1, kind: output, shape index: {}]  }
   0x1   :  { %v4_v0 = vld [vmem:[%s154_s0] ss:$0 sm:$0xff]  ;;  %v51_v1 = vld [vmem:[%s154_s0 + $0x1] ss:$0 sm:$0xff]  ;;  %v54_v2 = vld [vmem:[%s154_s0 + $0x2] ss:$0 sm:$0xff] }
   0x2   :  { %5 = vst [vmem:[%s155_s1] sm:$0xf] %v4_v0  ;;  %50 = vst [vmem:[%s155_s1 + $0x20] sm:$0xf] %v4_v0  ;;  %v57_v3 = vld [vmem:[%s154_s0 + $0x3] ss:$0 sm:$0xff] }
   0x3   :  { %52 = vst [vmem:[%s155_s1 + $0x4] sm:$0xf] %v51_v1  ;;  %53 = vst [vmem:[%s155_s1 + $0x24] sm:$0xf] %v51_v1  ;;  %v60_v4 = vld [vmem:[%s154_s0 + $0x4] ss:$0 sm:$0xff] }
   0x4   :  { %55 = vst [vmem:[%s155_s1 + $0x8] sm:$0xf] %v54_v2  ;;  %56 = vst [vmem:[%s155_s1 + $0x28] sm:$0xf] %v54_v2  ;;  %v63_v5 = vld [vmem:[%s154_s0 + $0x5] ss:$0 sm:$0xff] }
   0x5   :  { %58 = vst [vmem:[%s155_s1 + $0xc] sm:$0xf] %v57_v3  ;;  %59 = vst [vmem:[%s155_s1 + $0x2c] sm:$0xf] %v57_v3  ;;  %v66_v6 = vld [vmem:[%s154_s0 + $0x6] ss:$0 sm:$0xff] }
   0x6   :  { %61 = vst [vmem:[%s155_s1 + $0x10] sm:$0xf] %v60_v4  ;;  %62 = vst [vmem:[%s155_s1 + $0x30] sm:$0xf] %v60_v4  ;;  %v69_v7 = vld [vmem:[%s154_s0 + $0x7] ss:$0 sm:$0xff] }
   0x7   :  { %64 = vst [vmem:[%s155_s1 + $0x14] sm:$0xf] %v63_v5  ;;  %65 = vst [vmem:[%s155_s1 + $0x34] sm:$0xf] %v63_v5 }
   0x8   :  { %67 = vst [vmem:[%s155_s1 + $0x18] sm:$0xf] %v66_v6  ;;  %68 = vst [vmem:[%s155_s1 + $0x38] sm:$0xf] %v66_v6 }
   0x9   :  { %70 = vst [vmem:[%s155_s1 + $0x1c] sm:$0xf] %v69_v7  ;;  %71 = vst [vmem:[%s155_s1 + $0x3c] sm:$0xf] %v69_v7 }

// kernel: tile.24
= control target key start
LH: loop header
LB: loop body
LE: loop exit
PB: predicated region body
PF: predicated region fallthrough
CT: control target
= control target key end

     0   :  { %vm83_vm0 = vcmask 1047556   ;;  %vm85_vm1 = vcmask 64512   ;;  %s196_s9 = smov 24   ;;  %s197_s14 = smov 8   ;;  %vm104_vm2 = vcmask 261312   ;;  %vm125_vm3 = vcmask 195712   ;;  %s290_s0 = inlined_call_operand.vmem [shape: f32[2,8,4,8], index: 0, kind: input, shape index: {}]   ;;  %s291_s1 = inlined_call_operand.vmem [shape: f32[16,32], index: 1, kind: output, shape index: {}]  }
   0x1   :  { %v181_v0 = vld [vmem:[%s290_s0 + $0x1c] sm:$0xf]  ;;  %v182_v1 = vld [vmem:[%s290_s0 + $0x18] sm:$0xf]  ;;  %v183_v2 = vld [vmem:[%s290_s0 + $0x14] sm:$0xf] }
   0x2   :  { %49 = vst [vmem:[#allocation0 + $0x38] sm:$0xf] %v181_v0  ;;  %54 = vst [vmem:[#allocation0 + $0x30] sm:$0xf] %v182_v1  ;;  %v184_v3 = vld [vmem:[%s290_s0 + $0x10] sm:$0xf] }
   0x3   :  { %59 = vst [vmem:[#allocation0 + $0x28] sm:$0xf] %v183_v2  ;;  %v185_v4 = vld [vmem:[%s290_s0 + $0xc] sm:$0xf]  ;;  %v186_v5 = vld [vmem:[%s290_s0 + $0x8] sm:$0xf] }
   0x4   :  { %64 = vst [vmem:[#allocation0 + $0x20] sm:$0xf] %v184_v3  ;;  %69 = vst [vmem:[#allocation0 + $0x18] sm:$0xf] %v185_v4  ;;  %v187_v6 = vld [vmem:[%s290_s0 + $0x4] sm:$0xf] }
   0x5   :  { %74 = vst [vmem:[#allocation0 + $0x10] sm:$0xf] %v186_v5  ;;  %v79_v7 = vld [vmem:[%s290_s0] sm:$0xf]  ;;  %78 = vst [vmem:[#allocation0 + $0x8] sm:$0xf] %v187_v6 }
   0x6   :  { %80 = vst [vmem:[#allocation0] sm:$0xf] %v79_v7  ;;  %v173_v8 = vld [vmem:[%s290_s0 + $0x3c] sm:$0xf]  ;;  %v174_v9 = vld [vmem:[%s290_s0 + $0x38] sm:$0xf] }
   0x7   :  { %9 = vst [vmem:[#allocation0 + $0x78] sm:$0xf] %v173_v8  ;;  %14 = vst [vmem:[#allocation0 + $0x70] sm:$0xf] %v174_v9  ;;  %v175_v10 = vld [vmem:[%s290_s0 + $0x34] sm:$0xf] }
   0x8   :  { %v176_v11 = vld [vmem:[%s290_s0 + $0x30] sm:$0xf]  ;;  %v177_v12 = vld [vmem:[%s290_s0 + $0x2c] sm:$0xf]  ;;  %19 = vst [vmem:[#allocation0 + $0x68] sm:$0xf] %v175_v10 }
   0x9   :  { %24 = vst [vmem:[#allocation0 + $0x60] sm:$0xf] %v176_v11  ;;  %29 = vst [vmem:[#allocation0 + $0x58] sm:$0xf] %v177_v12  ;;  %v178_v13 = vld [vmem:[%s290_s0 + $0x28] sm:$0xf] }
   0xa   :  { %v179_v14 = vld [vmem:[%s290_s0 + $0x24] sm:$0xf]  ;;  %v180_v15 = vld [vmem:[%s290_s0 + $0x20] sm:$0xf]  ;;  %34 = vst [vmem:[#allocation0 + $0x50] sm:$0xf] %v178_v13 }
   0xb   :  { %39 = vst [vmem:[#allocation0 + $0x48] sm:$0xf] %v179_v14  ;;  %44 = vst [vmem:[#allocation0 + $0x40] sm:$0xf] %v180_v15  ;;  %s195_s0 = smov 16   ;;  %vm146_vm4 = vcmask 130112  }
   0xc   :  { %v120_v16 = vld [vmem:[#allocation0 + $0x2] ss:$8 sm:$0xf0]   ;;  %v99_v17 = vld [vmem:[#allocation0 + $0x3] ss:$8 sm:$0xf0]  }
   0xd   :  { %v118_v18 = vld [vmem:[#allocation0 + $0x2] ss:$8 sm:$0xf]   ;;  %v97_v19 = vld [vmem:[#allocation0 + $0x3] ss:$8 sm:$0xf]  }
   0xe   :  { %v122_v20 = vsel %vm83_vm0, %v120_v16, %v118_v18  ;;  %v101_v21 = vsel %vm83_vm0, %v99_v17, %v97_v19  ;;  %v139_v24 = vld [vmem:[#allocation0 + $0x1] ss:$8 sm:$0xf]   ;;  %v81_v32 = vld [vmem:[#allocation0] ss:$8 sm:$0xf]  }
   0xf   :  { %123 = vrot.lane.b32.xlu1 %v122_v20, %s195_s0  ;;  %102 = vrot.lane.b32.xlu0 %v101_v21, %s196_s9  ;;  %v141_v25 = vld [vmem:[#allocation0 + $0x1] ss:$8 sm:$0xf0]   ;;  %v82_v33 = vld [vmem:[#allocation0] ss:$8 sm:$0xf0]  }
  0x10   :  { %v130_v22 = vld [vmem:[#allocation0 + $0x42] ss:$8 sm:$0xf0]   ;;  %v109_v23 = vld [vmem:[#allocation0 + $0x43] ss:$8 sm:$0xf0]   ;;  %v84_v34 = vsel %vm83_vm0, %v82_v33, %v81_v32  ;;  %v143_v38 = vsel %vm83_vm0, %v141_v25, %v139_v24 }
  0x11   :  { %v151_v31 = vld [vmem:[#allocation0 + $0x41] ss:$8 sm:$0xf0]   ;;  %v90_v36 = vld [vmem:[#allocation0 + $0x40] ss:$8 sm:$0xf0]  }
  0x12   :  { %v128_v26 = vld [vmem:[#allocation0 + $0x42] ss:$8 sm:$0xf]   ;;  %v107_v27 = vld [vmem:[#allocation0 + $0x43] ss:$8 sm:$0xf]  }
  0x13   :  { %v132_v28 = vsel %vm83_vm0, %v130_v22, %v128_v26  ;;  %v111_v29 = vsel %vm83_vm0, %v109_v23, %v107_v27  ;;  %v149_v30 = vld [vmem:[#allocation0 + $0x41] ss:$8 sm:$0xf]   ;;  %v88_v35 = vld [vmem:[#allocation0 + $0x40] ss:$8 sm:$0xf]  }
  0x14   :  { %133 = vrot.lane.b32.xlu1 %v132_v28, %s195_s0  ;;  %112 = vrot.lane.b32.xlu0 %v111_v29, %s196_s9  ;;  %v153_v37 = vsel %vm83_vm0, %v151_v31, %v149_v30  ;;  %86 = vst.msk [vmem:[%s291_s1] sm:$0xff] %vm85_vm1, %v84_v34   ;;  %v92_v39 = vsel %vm83_vm0, %v90_v36, %v88_v35 }
  0x15   :  { %188 = vst.msk [vmem:[%s291_s1 + $0x8] sm:$0xff] %vm85_vm1, %v92_v39  }
  0x18   :  { %154 = vrot.lane.b32.xlu1 %v153_v37, %s197_s14  ;;  %144 = vrot.lane.b32.xlu0 %v143_v38, %s197_s14 }
  0x81   :  { %v124_v40 = vpop.permute.xlu1 %123   ;;  %v103_v41 = vpop.permute.xlu0 %102  }
  0x82   :  { %105 = vst.msk [vmem:[%s291_s1] sm:$0xff] %vm104_vm2, %v103_v41  }
  0x83   :  { %126 = vst.msk [vmem:[%s291_s1] sm:$0xff] %vm125_vm3, %v124_v40  }
  0x86   :  { %v134_v42 = vpop.permute.xlu1 %133   ;;  %v113_v43 = vpop.permute.xlu0 %112  }
  0x87   :  { %189 = vst.msk [vmem:[%s291_s1 + $0x8] sm:$0xff] %vm104_vm2, %v113_v43  }
  0x88   :  { %190 = vst.msk [vmem:[%s291_s1 + $0x8] sm:$0xff] %vm125_vm3, %v134_v42  }
  0x8a   :  { %v155_v44 = vpop.permute.xlu1 %154   ;;  %v145_v45 = vpop.permute.xlu0 %144  }
  0x8b   :  { %191 = vst.msk [vmem:[%s291_s1 + $0x8] sm:$0xff] %vm146_vm4, %v155_v44   ;;  %147 = vst.msk [vmem:[%s291_s1] sm:$0xff] %vm146_vm4, %v145_v45  }

// kernel: eq.28
= control target key start
LH: loop header
LB: loop body
LE: loop exit
PB: predicated region body
PF: predicated region fallthrough
CT: control target
= control target key end

     0   :  { %vm8_vm0 = vcmask 130048   ;;  %s40_s8 = smov 16   ;;  %s41_s9 = smov 32   ;;  %vm14_vm1 = vcmask 523648   ;;  %vm20_vm2 = vcmask 392448   ;;  %vm26_vm3 = vcmask 261248   ;;  %s58_s0 = inlined_call_operand.vmem [shape: s32[4,16], index: 0, kind: input, shape index: {}]   ;;  %s59_s1 = inlined_call_operand.vmem [shape: s32[64], index: 1, kind: output, shape index: {}]  }
   0x1   :  { %v5_v0 = vld [vmem:[%s58_s0] sm:$0xf]  ;;  %s39_s0 = smov 48  }
   0x2   :  { %6 = vst [vmem:[#allocation1] sm:$0xf] %v5_v0 }
   0x9   :  { %v11_v1 = vld [vmem:[#allocation1 + $0x3] sm:$0x1]   ;;  %v23_v2 = vld [vmem:[#allocation1 + $0x1] sm:$0x1]   ;;  %v7_v3 = vld [vmem:[#allocation1] sm:$0x1]  }
   0xa   :  { %12 = vrot.lane.b32.xlu0 %v11_v1, %s39_s0  ;;  %24 = vrot.lane.b32.xlu1 %v23_v2, %s40_s8  ;;  %v17_v4 = vld [vmem:[#allocation1 + $0x2] sm:$0x1]   ;;  %9 = vst.msk [vmem:[#allocation0] sm:$0x1] %vm8_vm0, %v7_v3  }
   0xe   :  { %18 = vrot.lane.b32.xlu0 %v17_v4, %s41_s9 }
  0x7c   :  { %v13_v5 = vpop.permute.xlu0 %12   ;;  %v25_v6 = vpop.permute.xlu1 %24  }
  0x7d   :  { %15 = vst.msk [vmem:[#allocation0] sm:$0x1] %vm14_vm1, %v13_v5  }
  0x80   :  { %v19_v7 = vpop.permute.xlu0 %18  }
  0x81   :  { %21 = vst.msk [vmem:[#allocation0] sm:$0x1] %vm20_vm2, %v19_v7  }
  0x82   :  { %27 = vst.msk [vmem:[#allocation0] sm:$0x1] %vm26_vm3, %v25_v6  }
  0x89   :  { %v32_v8 = vld [vmem:[#allocation0] sm:$0x1] }
  0x8a   :  { %35 = vst [vmem:[%s59_s1] sm:$0x1] %v32_v8 }

// kernel: eq.31
= control target key start
LH: loop header
LB: loop body
LE: loop exit
PB: predicated region body
PF: predicated region fallthrough
CT: control target
= control target key end

     0   :  { %vm8_vm0 = vcmask 64512   ;;  %s40_s8 = smov 8   ;;  %s41_s9 = smov 16   ;;  %vm14_vm1 = vcmask 261312   ;;  %vm20_vm2 = vcmask 195712   ;;  %vm26_vm3 = vcmask 130112   ;;  %s58_s0 = inlined_call_operand.vmem [shape: s32[4,8], index: 0, kind: input, shape index: {}]   ;;  %s59_s1 = inlined_call_operand.vmem [shape: s32[32], index: 1, kind: output, shape index: {}]  }
   0x1   :  { %v5_v0 = vld [vmem:[%s58_s0] sm:$0xf]  ;;  %s39_s0 = smov 24  }
   0x2   :  { %6 = vst [vmem:[#allocation1] sm:$0xf] %v5_v0 }
   0x9   :  { %v11_v1 = vld [vmem:[#allocation1 + $0x3] sm:$0x1]   ;;  %v23_v2 = vld [vmem:[#allocation1 + $0x1] sm:$0x1]   ;;  %v7_v3 = vld [vmem:[#allocation1] sm:$0x1]  }
   0xa   :  { %12 = vrot.lane.b32.xlu0 %v11_v1, %s39_s0  ;;  %24 = vrot.lane.b32.xlu1 %v23_v2, %s40_s8  ;;  %v17_v4 = vld [vmem:[#allocation1 + $0x2] sm:$0x1]   ;;  %9 = vst.msk [vmem:[#allocation0] sm:$0x1] %vm8_vm0, %v7_v3  }
   0xe   :  { %18 = vrot.lane.b32.xlu0 %v17_v4, %s41_s9 }
  0x7c   :  { %v13_v5 = vpop.permute.xlu0 %12   ;;  %v25_v6 = vpop.permute.xlu1 %24  }
  0x7d   :  { %15 = vst.msk [vmem:[#allocation0] sm:$0x1] %vm14_vm1, %v13_v5  }
  0x80   :  { %v19_v7 = vpop.permute.xlu0 %18  }
  0x81   :  { %21 = vst.msk [vmem:[#allocation0] sm:$0x1] %vm20_vm2, %v19_v7  }
  0x82   :  { %27 = vst.msk [vmem:[#allocation0] sm:$0x1] %vm26_vm3, %v25_v6  }
  0x89   :  { %v32_v8 = vld [vmem:[#allocation0] sm:$0x1] }
  0x8a   :  { %35 = vst [vmem:[%s59_s1] sm:$0x1] %v32_v8 }

// kernel: transformer_block.1
= control target key start
LH: loop header
LB: loop body
LE: loop exit
PB: predicated region body
PF: predicated region fallthrough
CT: control target
= control target key end

     0   :  { %vm44_vm0 = vcmask 261120   ;;  %s1277_s0 = inlined_call_operand.vmem [shape: f32[16,32], index: 0, kind: input, shape index: {}]   ;;  %s1278_s1 = inlined_call_operand.vmem [shape: f32[16,32], index: 1, kind: input, shape index: {}]   ;;  %s1279_s2 = inlined_call_operand.vmem [shape: f32[16,32], index: 2, kind: input, shape index: {}]   ;;  %s1280_s3 = inlined_call_operand.vmem [shape: f32[16,64], index: 3, kind: input, shape index: {}]   ;;  %s1281_s4 = inlined_call_operand.vmem [shape: f32[64,32], index: 4, kind: input, shape index: {}]   ;;  %s1282_s5 = inlined_call_operand.vmem [shape: f32[1,32], index: 5, kind: input, shape index: {}]   ;;  %s1283_s6 = inlined_call_operand.vmem [shape: f32[1,32], index: 6, kind: input, shape index: {}]   ;;  %s1284_s7 = inlined_call_operand.vmem [shape: bf16[32,160], index: 7, kind: input, shape index: {}]   ;;  %s1285_s8 = inlined_call_operand.vmem [shape: bf16[32,32], index: 8, kind: input, shape index: {}]   ;;  %s1286_s9 = inlined_call_operand.vmem [shape: bf16[32,256], index: 9, kind: input, shape index: {}]   ;;  %s1287_s10 = inlined_call_operand.vmem [shape: bf16[128,32], index: 10, kind: input, shape index: {}]   ;;  %s1288_s11 = inlined_call_operand.hbm [shape: f32[16,32], index: 11, kind: output, shape index: {}]  }
   0x1   :  { %v1005_v0 = vld [vmem:[%s1277_s0] sm:$0xff]  ;;  %v1010_v1 = vld [vmem:[%s1277_s0 + $0x8] sm:$0xff] }
   0x2   :  { %v42_v2 = vmul.f32 %v1005_v0, %v1005_v0  ;;  %v43_v3 = vmul.f32 %v1010_v1, %v1010_v1 }
   0x4   :  { %v45_v4 = vsel %vm44_vm0, %v42_v2, 0.0  ;;  %v48_v5 = vsel %vm44_vm0, %v43_v3, 0.0 }
   0x5   :  { %46 = vadd.xlane.f32.xlu0 %v45_v4 }
   0x9   :  { %49 = vadd.xlane.f32.xlu0 %v48_v5 }
   0xa   :  { %16 = vsyncpa [#allocation3], 0  ;;  %v865_v6 = vld [vmem:[%s1284_s7 + $0x14] ss:$8 sps:$4 sm:$0xff]   ;;  %v867_v7 = vld [vmem:[%s1284_s7 + $0x10] ss:$8 sps:$4 sm:$0xff]  }
   0xb   :  { %v868_v8 = vld [vmem:[%s1284_s7 + $0x4] ss:$8 sps:$4 sm:$0xff]   ;;  %109 = vmatprep.subr.bf16.mxu0 %v865_v6  ;;  %v933_v9 = vmov 0   ;;  %v870_v10 = vld [vmem:[%s1284_s7] ss:$8 sps:$4 sm:$0xff]   ;;  %s934_s13 = smov 64  }
   0xc   :  { %129 = vmatprep.mubr.bf16.mxu0 %v933_v9  ;;  %110 = vmatpush1.bf16.msra.mxu0 %v867_v7  ;;  %v1034_v11 = vld [vmem:[%s1278_s1] sm:$0xff]  ;;  %s935_s14 = smov 96   ;;  %v1045_v13 = vld [vmem:[%s1281_s4 + $0x28] sm:$0xff]  ;;  %v1056_v15 = vld [vmem:[%s1281_s4 + $0x18] sm:$0xff]  ;;  %v937_v49 = vmov 0.0   ;;  %vm938_vm1 = vmmov 0  }
   0xd   :  { %111 = vmatprep.subr.bf16.mxu0 %v868_v8  ;;  %v142_v12 = vld [vmem:[%s1279_s2] sm:$0xff]  ;;  %v143_v14 = vld [vmem:[%s1279_s2 + $0x8] sm:$0xff]  ;;  %v1075_v18 = vld [vmem:[%s1281_s4 + $0x30] sm:$0xff]  ;;  %792 = vmatprep.subr.bf16.mxu1 %v937_v49  ;;  %vm325_vm2 = vcmask 523264  }
   0xe   :  { %176 = vrot.lane.b32.xlu1 %v142_v12, %s935_s14  ;;  %v1061_v16 = vld [vmem:[%s1278_s1 + $0x8] sm:$0xff]  ;;  %s936_s1 = smov 32   ;;  %v737_v28 = vld [vmem:[%s1282_s5] ss:$0 sm:$0xff]  ;;  %v1101_v40 = vld [vmem:[%s1281_s4 + $0x38] sm:$0xff]  ;;  %800 = vmatprep.mubr.msk.bf16.mxu1 %vm938_vm1, %v937_v49 }
   0xf   :  { %v1070_v17 = vld [vmem:[%s1281_s4 + $0x8] sm:$0xff]  ;;  %v1108_v41 = vld [vmem:[%s1281_s4 + $0x20] sm:$0xff]  ;;  %v1115_v42 = vld [vmem:[%s1281_s4 + $0x10] sm:$0xff]  ;;  %v342_v46 = vpack.c.bf16 %v1101_v40, %v1075_v18 }
  0x10   :  { %112 = vmatpush1.bf16.msra.mxu0 %v870_v10  ;;  %v1122_v43 = vld [vmem:[%s1281_s4] sm:$0xff]  ;;  %v341_v50 = vpack.c.bf16 %v1045_v13, %v1108_v41  ;;  %v340_v53 = vpack.c.bf16 %v1056_v15, %v1115_v42 }
  0x11   :  { %804 = vmatprep.subr.bf16.mxu0 %v937_v49  ;;  %v339_v59 = vpack.c.bf16 %v1070_v17, %v1122_v43 }
  0x12   :  { %178 = vrot.lane.b32.xlu1 %v143_v14, %s935_s14 }
  0x16   :  { %170 = vrot.lane.b32.xlu1 %v1061_v16, %s934_s13 }
  0x1a   :  { %222 = vrot.lane.b32.xlu1 %v1075_v18, %s934_s13 }
  0x1f   :  { %168 = vrot.lane.b32.xlu0 %v1034_v11, %s934_s13 }
  0x23   :  { %220 = vrot.lane.b32.xlu0 %v1045_v13, %s934_s13 }
  0x27   :  { %216 = vrot.lane.b32.xlu0 %v1056_v15, %s934_s13 }
  0x2b   :  { %212 = vrot.lane.b32.xlu0 %v1070_v17, %s934_s13 }
  0x2f   :  { %150 = vrot.lane.b32.xlu0 %v143_v14, %s936_s1 }
  0x80   :  { %v177_v33 = vpop.permute.xlu1 %176 }
  0x84   :  { %v179_v37 = vpop.permute.xlu1 %178 }
  0x88   :  { %v171_v44 = vpop.permute.xlu1 %170 }
  0x8c   :  { %v223_v45 = vpop.permute.xlu1 %222 }
  0x8e   :  { %v47_v19 = vpop.xlane.xlu0 %46 }
  0x8f   :  { %v52_v20 = vmul.f32 0.03125, %v47_v19 }
  0x91   :  { %v54_v21 = vadd.f32 1e-06, %v52_v20 }
  0x92   :  { %v50_v22 = vpop.xlane.xlu0 %49 }
  0x93   :  { %887 = vrsqrt.f32 %v54_v21  ;;  %v53_v23 = vmul.f32 0.03125, %v50_v22 }
  0x95   :  { %v55_v24 = vadd.f32 1e-06, %v53_v23 }
  0x96   :  { %v169_v47 = vpop.permute.xlu0 %168 }
  0x97   :  { %889 = vrsqrt.f32 %v55_v24 }
  0x9a   :  { %v221_v56 = vpop.permute.xlu0 %220 }
  0x9e   :  { %v217_v63 = vpop.permute.xlu0 %216 }
  0xa0   :  { %v888_v25 = vpop.eup %887 }
  0xa1   :  { %v58_v26 = vmul.f32 %v888_v25, %v1005_v0 }
  0xa2   :  { %v213_v10 = vpop.permute.xlu0 %212 }
  0xa3   :  { %v67_v30 = vmul.f32 %v737_v28, %v58_v26 }
  0xa4   :  { %v890_v27 = vpop.eup %889 }
  0xa5   :  { %v59_v29 = vmul.f32 %v890_v27, %v1010_v1 }
  0xa6   :  { %v151_v22 = vpop.permute.xlu0 %150 }
  0xa7   :  { %v68_v31 = vmul.f32 %v737_v28, %v59_v29 }
  0xa9   :  { %v69_v32 = vpack.c.bf16 %v68_v31, %v67_v30 }
  0xab   :  { %742 = vmatmul.mubr.msk.bf16.vlgmr.msra.gmra.mxu0 %vm44_vm0, %v69_v32 }
  0xac   :  { %805 = vmatpush3.bf16.msra.mxu0 %v342_v46  ;;  %812 = vmatprep.mubr.msk.bf16.mxu0 %vm938_vm1, %v937_v49 }
  0xad   :  { %806 = vmatprep.subr.bf16.mxu0 %v937_v49 }
  0xb0   :  { %807 = vmatpush3.bf16.msra.mxu0 %v341_v50 }
  0xb1   :  { %808 = vmatprep.subr.bf16.mxu0 %v937_v49 }
  0xb4   :  { %809 = vmatpush3.bf16.msra.mxu0 %v340_v53 }
  0xb5   :  { %810 = vmatprep.subr.bf16.mxu0 %v937_v49 }
  0xb8   :  { %811 = vmatpush3.bf16.msra.mxu0 %v339_v59 }
  0xb9   :  { %816 = vmatprep.subr.bf16.mxu0 %v937_v49 }
 0x16b   :  { %v1088_v34 = vpop.f32.mrf.mxu0 }
 0x16c   :  { %v182_v35 = vmul.f32 %v177_v33, %v1088_v34  ;;  %v174_v51 = vmul.f32 %v169_v47, %v1088_v34 }
 0x16d   :  { %v1091_v36 = vpop.f32.mrf.mxu0 }
 0x16e   :  { %186 = vrot.lane.b32.xlu1 %v182_v35, %s935_s14 }
 0x16f   :  { %v1094_v38 = vpop.f32.mrf.mxu0 }
 0x170   :  { %v183_v39 = vmul.f32 %v179_v37, %v1094_v38  ;;  %v175_v55 = vmul.f32 %v171_v44, %v1094_v38  ;;  %v155_v25 = vmul.f32 %v151_v22, %v1094_v38  ;;  %v145_v37 = vmul.f32 %v1061_v16, %v1094_v38 }
 0x171   :  { %v144_v44 = vmul.f32 %v1034_v11, %v1088_v34  ;;  %v256_v11 = vld [vmem:[%s1280_s3 + $0x8] sm:$0xff] }
 0x172   :  { %188 = vrot.lane.b32.xlu1 %v183_v39, %s935_s14 }
 0x176   :  { %224 = vrot.lane.b32.xlu1 %v1101_v40, %s934_s13 }
 0x17a   :  { %218 = vrot.lane.b32.xlu1 %v1108_v41, %s934_s13 }
 0x17e   :  { %214 = vrot.lane.b32.xlu1 %v1115_v42, %s934_s13 }
 0x182   :  { %210 = vrot.lane.b32.xlu1 %v1122_v43, %s934_s13 }
 0x186   :  { %148 = vrot.lane.b32.xlu1 %v142_v12, %s936_s1 }
 0x1e0   :  { %v187_v48 = vpop.permute.xlu1 %186 }
 0x1e1   :  { %v192_v54 = vadd.f32 %v187_v48, %v174_v51  ;;  %v255_v48 = vld [vmem:[%s1280_s3] sm:$0xff] }
 0x1e3   :  { %v240_v60 = vmul.f32 %v223_v45, %v192_v54 }
 0x1e4   :  { %v189_v52 = vpop.permute.xlu1 %188 }
 0x1e5   :  { %v193_v57 = vadd.f32 %v189_v52, %v175_v55 }
 0x1e7   :  { %v239_v4 = vmul.f32 %v221_v56, %v193_v57  ;;  %v237_v8 = vmul.f32 %v217_v63, %v193_v57  ;;  %v235_v20 = vmul.f32 %v213_v10, %v193_v57 }
 0x1e8   :  { %v225_v58 = vpop.permute.xlu1 %224 }
 0x1e9   :  { %v241_v61 = vmul.f32 %v225_v58, %v193_v57 }
 0x1eb   :  { %v254_v62 = vpack.c.bf16 %v241_v61, %v240_v60  ;;  %v137_v61 = vpop.f32.mrf.mxu0 }
 0x1ec   :  { %v219_v2 = vpop.permute.xlu1 %218 }
 0x1ed   :  { %v238_v3 = vmul.f32 %v219_v2, %v192_v54  ;;  %267 = vrot.lane.b32.xlu1 %v254_v62, %s934_s13  ;;  %v249_v62 = vmul.f32 %v1101_v40, %v137_v61  ;;  %v245_v40 = vmul.f32 %v1056_v15, %v137_v61  ;;  %v871_v15 = vld [vmem:[%s1285_s8 + $0x8] sm:$0xff]  }
 0x1ef   :  { %v253_v5 = vpack.c.bf16 %v239_v4, %v238_v3  ;;  %v248_v3 = vmul.f32 %v1075_v18, %v1091_v36  ;;  %v244_v18 = vmul.f32 %v1115_v42, %v1091_v36 }
 0x1f0   :  { %v215_v6 = vpop.permute.xlu1 %214 }
 0x1f1   :  { %v236_v7 = vmul.f32 %v215_v6, %v192_v54  ;;  %265 = vrot.lane.b32.xlu0 %v253_v5, %s934_s13  ;;  %v247_v5 = vmul.f32 %v1045_v13, %v137_v61  ;;  %v390_v6 = vpack.c.bf16 %v249_v62, %v248_v3  ;;  %v243_v13 = vmul.f32 %v1070_v17, %v137_v61  ;;  %v872_v17 = vld [vmem:[%s1285_s8] sm:$0xff]   ;;  %v883_v61 = vld [vmem:[%s1287_s10 + $0x18] sm:$0xff]   ;;  %v884_v62 = vld [vmem:[%s1287_s10 + $0x10] sm:$0xff]  }
 0x1f2   :  { %v388_v10 = vpack.c.bf16 %v245_v40, %v244_v18 }
 0x1f3   :  { %v252_v12 = vpack.c.bf16 %v237_v8, %v236_v7  ;;  %v246_v7 = vmul.f32 %v1108_v41, %v1091_v36  ;;  %v242_v41 = vmul.f32 %v1122_v43, %v1091_v36 }
 0x1f4   :  { %v211_v14 = vpop.permute.xlu1 %210 }
 0x1f5   :  { %v234_v19 = vmul.f32 %v211_v14, %v192_v54  ;;  %263 = vrot.lane.b32.xlu1 %v252_v12, %s934_s13  ;;  %v389_v8 = vpack.c.bf16 %v247_v5, %v246_v7  ;;  %v387_v12 = vpack.c.bf16 %v243_v13, %v242_v41 }
 0x1f7   :  { %v251_v21 = vpack.c.bf16 %v235_v20, %v234_v19 }
 0x1f8   :  { %v149_v23 = vpop.permute.xlu1 %148 }
 0x1f9   :  { %v154_v24 = vmul.f32 %v149_v23, %v1088_v34  ;;  %261 = vrot.lane.b32.xlu0 %v251_v21, %s934_s13 }
 0x1fb   :  { %158 = vrot.lane.b32.xlu1 %v154_v24, %s935_s14 }
 0x1fd   :  { %160 = vrot.lane.b32.xlu0 %v155_v25, %s935_s14 }
 0x25f   :  { %v268_v26 = vpop.permute.xlu1 %267 }
 0x260   :  { %v282_v27 = vsel %vm44_vm0, %v268_v26, 0 }
 0x261   :  { %793 = vmatpush3.bf16.xpose.msra.mxu1 %v282_v27 }
 0x262   :  { %794 = vmatprep.subr.bf16.mxu1 %v937_v49 }
 0x263   :  { %v266_v28 = vpop.permute.xlu0 %265 }
 0x264   :  { %v279_v29 = vsel %vm44_vm0, %v266_v28, 0 }
 0x267   :  { %v264_v30 = vpop.permute.xlu1 %263 }
 0x268   :  { %v276_v31 = vsel %vm44_vm0, %v264_v30, 0 }
 0x269   :  { %795 = vmatpush3.bf16.xpose.msra.mxu1 %v279_v29 }
 0x26a   :  { %796 = vmatprep.subr.bf16.mxu1 %v937_v49 }
 0x26b   :  { %v262_v32 = vpop.permute.xlu0 %261 }
 0x26c   :  { %v273_v35 = vsel %vm44_vm0, %v262_v32, 0 }
 0x26d   :  { %v159_v39 = vpop.permute.xlu1 %158 }
 0x26e   :  { %v164_v46 = vadd.f32 %v159_v39, %v144_v44  ;;  %v873_v44 = vld [vmem:[%s1286_s9 + $0x10] ss:$8 sps:$4 sm:$0xff]  }
 0x26f   :  { %v161_v33 = vpop.permute.xlu0 %160 }
 0x270   :  { %v165_v45 = vadd.f32 %v161_v33, %v145_v37 }
 0x271   :  { %797 = vmatpush3.bf16.xpose.msra.mxu1 %v276_v31 }
 0x272   :  { %798 = vmatprep.subr.bf16.mxu1 %v937_v49  ;;  %v250_v47 = vpack.c.bf16 %v165_v45, %v164_v46  ;;  %v878_v45 = vld [vmem:[%s1286_s9 + $0x4] ss:$8 sps:$4 sm:$0xff]  }
 0x279   :  { %799 = vmatpush3.bf16.xpose.msra.mxu1 %v273_v35 }
 0x27a   :  { %836 = vmatprep.subr.bf16.mxu1 %v937_v49 }
 0x280   :  { %801 = vmatmul.mubr.msk.bf16.vlgmr.msra.gmra.mxu1 %vm44_vm0, %v250_v47 }
 0x281   :  { %852 = vmatprep.mubr.msk.bf16.mxu1 %vm938_vm1, %v937_v49 }
 0x340   :  { %v318_v16 = vpop.f32.mrf.mxu1 }
 0x341   :  { %v319_v38 = vadd.f32 %v318_v16, %v255_v48 }
 0x342   :  { %v802_v50 = vpop.f32.mrf.mxu1 }
 0x343   :  { %v326_v34 = vsel %vm325_vm2, %v319_v38, -inf }
 0x344   :  { %327 = vmax.xlane.f32.xlu1 %v326_v34  ;;  %v321_v51 = vpop.f32.mrf.mxu1 }
 0x345   :  { %v322_v52 = vadd.f32 %v321_v51, %v256_v11 }
 0x346   :  { %v803_v53 = vpop.f32.mrf.mxu1 }
 0x347   :  { %v329_v54 = vsel %vm325_vm2, %v322_v52, -inf }
 0x348   :  { %330 = vmax.xlane.f32.xlu0 %v329_v54 }
 0x3cd   :  { %v328_v55 = vpop.xlane.xlu1 %327 }
 0x3ce   :  { %v332_v56 = vsub.f32 %v319_v38, %v328_v55 }
 0x3d0   :  { %v334_v57 = vmul.f32 1.442695, %v332_v56 }
 0x3d1   :  { %v331_v58 = vpop.xlane.xlu0 %330 }
 0x3d2   :  { %v333_v59 = vsub.f32 %v322_v52, %v331_v58  ;;  %891 = vpow2.f32 %v334_v57  ;;  %v749_v52 = vld [vmem:[%s1283_s6] ss:$0 sm:$0xff]  ;;  %v879_v57 = vld [vmem:[%s1287_s10 + $0x38] sm:$0xff]   ;;  %v880_v58 = vld [vmem:[%s1287_s10 + $0x30] sm:$0xff]  }
 0x3d3   :  { %837 = vmatpush3.bf16.msra.mxu1 %v879_v57 }
 0x3d4   :  { %v336_v60 = vmul.f32 1.442695, %v333_v59  ;;  %838 = vmatprep.subr.bf16.mxu1 %v937_v49  ;;  %v881_v59 = vld [vmem:[%s1287_s10 + $0x28] sm:$0xff]  }
 0x3d6   :  { %893 = vpow2.f32 %v336_v60  ;;  %v882_v60 = vld [vmem:[%s1287_s10 + $0x20] sm:$0xff]  }
 0x3d7   :  { %839 = vmatpush3.bf16.msra.mxu1 %v880_v58 }
 0x3d8   :  { %840 = vmatprep.subr.bf16.mxu1 %v937_v49 }
 0x3db   :  { %841 = vmatpush3.bf16.msra.mxu1 %v881_v59 }
 0x3dc   :  { %842 = vmatprep.subr.bf16.mxu1 %v937_v49 }
 0x3df   :  { %v892_v63 = vpop.eup %891  ;;  %843 = vmatpush3.bf16.msra.mxu1 %v882_v60 }
 0x3e0   :  { %844 = vmatprep.subr.bf16.mxu1 %v937_v49 }
 0x3e3   :  { %v894_v2 = vpop.eup %893  ;;  %845 = vmatpush3.bf16.msra.mxu1 %v883_v61 }
 0x3e4   :  { %v338_v4 = vpack.c.bf16 %v894_v2, %v892_v63  ;;  %846 = vmatprep.subr.bf16.mxu1 %v937_v49  ;;  %v885_v63 = vld [vmem:[%s1287_s10 + $0x8] sm:$0xff]   ;;  %v886_v2 = vld [vmem:[%s1287_s10] sm:$0xff]   ;;  %s939_s10 = smov [#allocation2]  }
 0x3e5   :  { %s726_s16 = sshll.u32 %s939_s10, 4  ;;  %s727_s16 = int_to_ptr.vmem [resolvable:$true] %s726_s16 }
 0x3e6   :  { %813 = vmatmul.mubr.msk.bf16.vlgmr.msra.gmra.mxu0 %vm325_vm2, %v338_v4  ;;  %s911_s17 = scalar_lea.vmem %s727_s16, 256  ;;  %p916_p1 = scmp.lt.s32.totalorder %s727_s16, %s727_s16 }
 0x3e7   :  { %817 = vmatpush3.bf16.msra.mxu0 %v390_v6  ;;  %824 = vmatprep.mubr.msk.bf16.mxu0 %vm938_vm1, %v937_v49  ;;  %p912_p0 = scmp.ne.s32.totalorder %s727_s16, %s911_s17  ;;  %p917_p2 = scmp.lt.s32.totalorder %s911_s17, %s911_s17 }
 0x3e8   :  { %818 = vmatprep.subr.bf16.mxu0 %v937_v49  ;;  %847 = vmatpush3.bf16.msra.mxu1 %v884_v62 }
 0x3e9   :  { %848 = vmatprep.subr.bf16.mxu1 %v937_v49  ;;  %p918_p3 = por %p917_p2, %p916_p1 }
 0x3eb   :  { %819 = vmatpush3.bf16.msra.mxu0 %v389_v8  ;;  %p919_p4 = pnand %p918_p3, %p912_p0 }
 0x3ec   :  { %820 = vmatprep.subr.bf16.mxu0 %v937_v49  ;;  %849 = vmatpush3.bf16.msra.mxu1 %v885_v63 }
 0x3ed   :  { %850 = vmatprep.subr.bf16.mxu1 %v937_v49 }
 0x3ef   :  { %821 = vmatpush3.bf16.msra.mxu0 %v388_v10 }
 0x3f0   :  { %822 = vmatprep.subr.bf16.mxu0 %v937_v49  ;;  %851 = vmatpush3.bf16.msra.mxu1 %v886_v2 }
 0x3f3   :  { %823 = vmatpush3.bf16.msra.mxu0 %v387_v12 }
 0x3f4   :  { %828 = vmatprep.subr.bf16.mxu0 %v937_v49 }
 0x3f6   :  { %825 = vmatmul.mubr.msk.bf16.vlgmr.msra.gmra.mxu0 %vm325_vm2, %v338_v4 }
 0x3f7   :  { %832 = vmatprep.mubr.msk.bf16.mxu0 %vm938_vm1, %v937_v49  ;;  %829 = vmatpush3.bf16.msra.mxu0 %v871_v15 }
 0x3f8   :  { %830 = vmatprep.subr.bf16.mxu0 %v937_v49 }
 0x3fb   :  { %831 = vmatpush3.bf16.msra.mxu0 %v872_v17 }
 0x4a6   :  { %v380_v36 = vpop.f32.mrf.mxu0 }
 0x4a7   :  { %895 = vrcp.f32 %v380_v36 }
 0x4a8   :  { %v814_v42 = vpop.f32.mrf.mxu0 }
 0x4aa   :  { %v383_v43 = vpop.f32.mrf.mxu0 }
 0x4ab   :  { %897 = vrcp.f32 %v383_v43 }
 0x4ac   :  { %v815_v14 = vpop.f32.mrf.mxu0 }
 0x4b4   :  { %v896_v20 = vpop.eup %895 }
 0x4b6   :  { %v425_v19 = vpop.f32.mrf.mxu0 }
 0x4b7   :  { %v434_v24 = vmul.f32 %v896_v20, %v425_v19 }
 0x4b8   :  { %v898_v21 = vpop.eup %897  ;;  %v826_v22 = vpop.f32.mrf.mxu0 }
 0x4ba   :  { %v428_v23 = vpop.f32.mrf.mxu0 }
 0x4bb   :  { %v435_v25 = vmul.f32 %v898_v21, %v428_v23 }
 0x4bc   :  { %v827_v26 = vpop.f32.mrf.mxu0 }
 0x4bd   :  { %v436_v27 = vpack.c.bf16 %v435_v25, %v434_v24 }
 0x4bf   :  { %833 = vmatmul.mubr.msk.bf16.vlgmr.msra.gmra.mxu0 %vm44_vm0, %v436_v27 }
 0x4c0   :  { %584 = vmatprep.mubr.bf16.mxu0 %v933_v9 }
 0x57f   :  { %v490_v28 = vpop.f32.mrf.mxu0 }
 0x580   :  { %v1210_v29 = vadd.f32 %v490_v28, %v1005_v0  ;;  %v875_v0 = vld [vmem:[%s1286_s9 + $0x14] ss:$8 sps:$4 sm:$0xff]  }
 0x581   :  { %v834_v30 = vpop.f32.mrf.mxu0  ;;  %564 = vmatprep.subr.bf16.mxu0 %v875_v0 }
 0x582   :  { %v499_v31 = vmul.f32 %v1210_v29, %v1210_v29  ;;  %565 = vmatpush1.bf16.msra.mxu0 %v873_v44 }
 0x583   :  { %v493_v32 = vpop.f32.mrf.mxu0  ;;  %566 = vmatprep.subr.bf16.mxu0 %v878_v45 }
 0x584   :  { %v1215_v33 = vadd.f32 %v493_v32, %v1010_v1  ;;  %v501_v35 = vsel %vm44_vm0, %v499_v31, 0.0  ;;  %v876_v1 = vld [vmem:[%s1286_s9] ss:$8 sps:$4 sm:$0xff]  }
 0x585   :  { %502 = vadd.xlane.f32.xlu0 %v501_v35  ;;  %v835_v37 = vpop.f32.mrf.mxu0 }
 0x586   :  { %v500_v39 = vmul.f32 %v1215_v33, %v1215_v33  ;;  %567 = vmatpush1.bf16.msra.mxu0 %v876_v1 }
 0x588   :  { %v504_v9 = vsel %vm44_vm0, %v500_v39, 0.0 }
 0x589   :  { %505 = vadd.xlane.f32.xlu1 %v504_v9 }
 0x60e   :  { %v503_v46 = vpop.xlane.xlu0 %502 }
 0x60f   :  { %v507_v47 = vmul.f32 0.03125, %v503_v46 }
 0x611   :  { %v509_v48 = vadd.f32 1e-06, %v507_v47 }
 0x612   :  { %v506_v16 = vpop.xlane.xlu1 %505 }
 0x613   :  { %899 = vrsqrt.f32 %v509_v48  ;;  %v508_v38 = vmul.f32 0.03125, %v506_v16 }
 0x615   :  { %v510_v50 = vadd.f32 1e-06, %v508_v38 }
 0x617   :  { %901 = vrsqrt.f32 %v510_v50 }
 0x620   :  { %v900_v11 = vpop.eup %899 }
 0x621   :  { %v513_v34 = vmul.f32 %v900_v11, %v1210_v29 }
 0x623   :  { %v522_v54 = vmul.f32 %v749_v52, %v513_v34 }
 0x624   :  { %v902_v51 = vpop.eup %901 }
 0x625   :  { %v514_v53 = vmul.f32 %v902_v51, %v1215_v33 }
 0x627   :  { %v523_v55 = vmul.f32 %v749_v52, %v514_v53 }
 0x629   :  { %v524_v56 = vpack.c.bf16 %v523_v55, %v522_v54 }
 0x62b   :  { %754 = vmatmul.mubr.msk.bf16.vlgmr.msra.gmra.mxu0 %vm44_vm0, %v524_v56 }
 0x6eb   :  { %v586_v3 = vpop.f32.mrf.mxu0 }
 0x6ec   :  { %v755_v4 = vmul.f32 -1.442695, %v586_v3 }
 0x6ed   :  { %v588_v5 = vpop.f32.mrf.mxu0 }
 0x6ee   :  { %903 = vpow2.f32 %v755_v4 }
 0x6ef   :  { %v590_v6 = vpop.f32.mrf.mxu0 }
 0x6f0   :  { %v756_v7 = vmul.f32 -1.442695, %v590_v6 }
 0x6f1   :  { %v592_v15 = vpop.f32.mrf.mxu0 }
 0x6f2   :  { %905 = vpow2.f32 %v756_v7 }
 0x6fb   :  { %v904_v40 = vpop.eup %903 }
 0x6fc   :  { %v601_v8 = vadd.f32 1.0, %v904_v40 }
 0x6fe   :  { %907 = vrcp.f32 %v601_v8 }
 0x6ff   :  { %v906_v18 = vpop.eup %905 }
 0x700   :  { %v602_v13 = vadd.f32 1.0, %v906_v18 }
 0x702   :  { %909 = vrcp.f32 %v602_v13 }
 0x70b   :  { %v908_v10 = vpop.eup %907 }
 0x70c   :  { %v607_v49 = vmul.f32 %v908_v10, %v586_v3 }
 0x70e   :  { %v609_v17 = vmul.f32 %v607_v49, %v588_v5 }
 0x70f   :  { %v910_v41 = vpop.eup %909 }
 0x710   :  { %v608_v12 = vmul.f32 %v910_v41, %v590_v6 }
 0x712   :  { %v610_v36 = vmul.f32 %v608_v12, %v592_v15 }
 0x714   :  { %v611_v42 = vpack.c.bf16 %v610_v36, %v609_v17 }
 0x716   :  { %853 = vmatmul.mubr.bf16.vlgmr.msra.gmra.mxu1 %v611_v42 }
 0x7d6   :  { %v710_v43 = vpop.f32.mrf.mxu1 }
 0x7d7   :  { %v717_v14 = vadd.f32 %v710_v43, %v1210_v29 }
 0x7d8   :  { %v854_v19 = vpop.f32.mrf.mxu1 }
 0x7d9   :  { %719 = vst.msk [vmem:[#allocation2] sm:$0xff] %vm44_vm0, %v717_v14 }
 0x7da   :  { %v713_v20 = vpop.f32.mrf.mxu1 }
 0x7db   :  { %v718_v21 = vadd.f32 %v713_v20, %v1215_v33 }
 0x7dc   :  { %v855_v22 = vpop.f32.mrf.mxu1 }
 0x7dd   :  { %720 = vst.msk [vmem:[#allocation2 + $0x8] sm:$0xff] %vm44_vm0, %v718_v21 }
 0x7de   :  { %922 = shalt.err (!%p919_p4)
}
 0x7df   :  { %s940_s18 = smov 128   ;;  %s941_s8 = smov 8  }
 0x7e0   :  { %732 = dma.vmem_to_hbm [thread:$0]  %s727_s16, 256, %s1288_s11, [#allocation3], %s940_s18, %s940_s18, %s941_s8  }
 0x7e1   :  { %931 = dma.done.wait [#allocation3], 256  }
 0x7e2   :  { %932 = vsyncadd [#allocation3], 4294967040 }
 0x7e3   :  { %736 = vsyncpa [#allocation3], 1 }

</bundles_post_ra>
